<compile_context>
chip_gen: v7x
topology: tpu7x:2x2x1
jax: 0.10.0
libtpu: 0.0.40
codegen_flags: <defaults>
</compile_context>

<pallas_src>
import numpy as np
import jax
import jax.numpy as jnp
from jax.experimental import pallas as pl
from jax.experimental.pallas import tpu as pltpu

NUM_CLASSES = 5      # self.affine = nn.Linear(config.hidden_size, 5)
CLS_PAD = 8          # sublane-aligned padded class count (real classes = 5)
LANE = 128           # lane-dense padded class dimension used inside the kernels


def _round_up(x, m):
    return (x + m - 1) // m * m


def _pick_bm(bm, nt, align):
    """Token-tile clamp: multiple of `align`; keep >= 2 grid blocks when there
    is enough work (v7x has 2 TensorCores sharing the 'parallel' grid axis)."""
    bm = max(align, _round_up(bm, align))
    cap = max(align, _round_up(nt, align))
    if nt > align:
        cap = min(cap, max(align, _round_up(pl.cdiv(nt, 2), align)))
    return min(bm, cap)


# ----------------------------------------------------------------------------
# Kernel 1: affine head, logits path.
#   x:(bm,H) f32 (cast to bf16 in-kernel), w:(H,128) bf16  ->  out:(bm,8) f32
# ----------------------------------------------------------------------------
def _affine_logits_kernel(x_ref, w_ref, b_ref, out_ref):
    xb = x_ref[...].astype(jnp.bfloat16)                       # cast under DMA
    logits = jnp.dot(xb, w_ref[...],
                     preferred_element_type=jnp.float32)       # (bm, 128) f32
    # Narrow to the 8 lane-padded real classes before the HBM store
    # (in-VMEM lane-narrowing copy is negligible vs the saved HBM bytes).
    out_ref[...] = logits[:, :CLS_PAD] + b_ref[...]


# ----------------------------------------------------------------------------
# Kernel 2: affine head + masked cross-entropy, classes on SUBLANES.
#   emits a lane-dense (8,128) partial block: [0,0]=sum(mask*CE), [0,1]=sum(mask)
# ----------------------------------------------------------------------------
def _make_loss_kernel(bm, nt, num_classes, cls_pad):
    def kernel(x_ref, mask_ref, lbl_ref, w_ref, b_ref, out_ref):
        xb = x_ref[...].astype(jnp.bfloat16)                   # (bm, H)
        # Classes-major matmul: (128, bm) = W_cm(128,H) @ xb^T  (A @ B^T form).
        zt = jax.lax.dot_general(
            w_ref[...], xb,
            dimension_numbers=(((1,), (1,)), ((), ())),
            preferred_element_type=jnp.float32)                # (128, bm)
        z = zt[:cls_pad, :] + b_ref[...]                       # (8, bm), aligned sublane slice

        cls = jax.lax.broadcasted_iota(jnp.int32, (cls_pad, bm), 0)
        zm = jnp.where(cls < num_classes, z, -1e30)            # hide padded classes
        zmax = jnp.max(zm, axis=0, keepdims=True)              # (1, bm)
        lse = zmax + jnp.log(jnp.sum(jnp.exp(zm - zmax), axis=0, keepdims=True))

        # Gather the label logit with a sublane-compare.
        # NOTE: labels are assumed in [0, num_classes); out-of-range labels at a
        # masked-out position are harmless, at a mask==1 position they would
        # contribute `lse - 0` (PyTorch would raise for them anyway).
        lbl = lbl_ref[...]                                     # (1, bm) int32
        picked = jnp.sum(jnp.where(cls == lbl, z, 0.0), axis=0, keepdims=True)
        per_tok = lse - picked                                 # CE, (1, bm)

        # Ragged-tail masking: no host-side padding of the inputs; tail columns
        # of the last partial block hold undefined data and are zeroed here.
        col = (pl.program_id(0) * bm
               + jax.lax.broadcasted_iota(jnp.int32, (1, bm), 1))
        valid = col < nt
        am = jnp.where(valid, mask_ref[...].astype(jnp.float32), 0.0)
        contrib = jnp.where(valid & (am > 0.0), am * per_tok, 0.0)

        loss_sum = jnp.sum(contrib)
        mask_sum = jnp.sum(am)

        # Lane-dense partial-sum block: row 0 / lanes 0,1 hold the two sums.
        r = jax.lax.broadcasted_iota(jnp.int32, (8, LANE), 0)
        l = jax.lax.broadcasted_iota(jnp.int32, (8, LANE), 1)
        out_ref[...] = jnp.where((r == 0) & (l == 0), loss_sum,
                                 jnp.where((r == 0) & (l == 1), mask_sum, 0.0))
    return kernel


# ----------------------------------------------------------------------------
# Wrappers
# ----------------------------------------------------------------------------
def affine_logits(sequence_output, w_hn, b_row, *, bm=512):
    """sequence_output [N, L, H] (f32) -> logits [N, L, 5] (f32)."""
    N, L, H = sequence_output.shape
    NT = N * L
    x = sequence_output.reshape(NT, H)          # no dtype cast (cast in-kernel)
    bm = _pick_bm(bm, NT, 8)
    grid = (pl.cdiv(NT, bm),)

    cost = pl.CostEstimate(
        flops=2 * NT * H * LANE,
        transcendentals=0,
        bytes_accessed=NT * H * 4 + H * LANE * 2 + NT * CLS_PAD * 4)

    out = pl.pallas_call(
        _affine_logits_kernel,
        out_shape=jax.ShapeDtypeStruct((NT, CLS_PAD), jnp.float32),
        grid_spec=pltpu.PrefetchScalarGridSpec(
            num_scalar_prefetch=0,
            grid=grid,
            in_specs=[
                pl.BlockSpec((bm, H), lambda i: (i, 0)),        # activations (f32)
                pl.BlockSpec((H, LANE), lambda i: (0, 0)),      # affine weight (resident)
                pl.BlockSpec((1, CLS_PAD), lambda i: (0, 0)),   # affine bias
            ],
            # Tail rows of the last partial block are computed from undefined
            # data; Pallas discards the out-of-range writes on writeback.
            out_specs=pl.BlockSpec((bm, CLS_PAD), lambda i: (i, 0)),
        ),
        compiler_params=pltpu.CompilerParams(
            dimension_semantics=("parallel",),
            vmem_limit_bytes=32 * 1024 * 1024),
        cost_estimate=cost,
    )(x, w_hn, b_row)
    return out[:, :NUM_CLASSES].reshape(N, L, NUM_CLASSES)


def affine_masked_ce_loss(sequence_output, attention_mask, labels, w_cm, b_cm,
                          *, bm=512):
    """Masked token cross-entropy: sum(mask*CE)/sum(mask), returns a scalar."""
    N, L, H = sequence_output.shape
    NT = N * L
    x = sequence_output.reshape(NT, H)          # no dtype cast (cast in-kernel)
    mask2 = attention_mask.reshape(1, NT).astype(jnp.int32)
    lbl2 = labels.reshape(1, NT).astype(jnp.int32)
    # mask/label blocks are (1, bm) of a (1, NT) array -> bm must be a lane
    # multiple (128) for the BlockSpec last-dim rule.
    bm = _pick_bm(bm, NT, 128)
    nblocks = pl.cdiv(NT, bm)

    cost = pl.CostEstimate(
        flops=2 * NT * H * LANE + 16 * NT * CLS_PAD,
        transcendentals=NT * (CLS_PAD + 1),
        bytes_accessed=NT * H * 4 + NT * 8 + LANE * H * 2 + nblocks * 8 * LANE * 4)

    kernel = _make_loss_kernel(bm, NT, NUM_CLASSES, CLS_PAD)
    partial = pl.pallas_call(
        kernel,
        out_shape=jax.ShapeDtypeStruct((nblocks * 8, LANE), jnp.float32),
        grid_spec=pltpu.PrefetchScalarGridSpec(
            num_scalar_prefetch=0,
            grid=(nblocks,),
            in_specs=[
                pl.BlockSpec((bm, H), lambda i: (i, 0)),        # activations (f32)
                pl.BlockSpec((1, bm), lambda i: (0, i)),        # attention mask
                pl.BlockSpec((1, bm), lambda i: (0, i)),        # labels
                pl.BlockSpec((LANE, H), lambda i: (0, 0)),      # classes-major weight
                pl.BlockSpec((CLS_PAD, 1), lambda i: (0, 0)),   # classes-major bias
            ],
            out_specs=pl.BlockSpec((8, LANE), lambda i: (i, 0)),
        ),
        compiler_params=pltpu.CompilerParams(
            dimension_semantics=("parallel",),
            vmem_limit_bytes=32 * 1024 * 1024),
        cost_estimate=cost,
    )(x, mask2, lbl2, w_cm, b_cm)

    loss_sum = jnp.sum(partial[:, 0])
    mask_sum = jnp.sum(partial[:, 1])
    # Guard against an all-zero mask (PyTorch would return NaN there).
    return jnp.where(mask_sum > 0, loss_sum / jnp.maximum(mask_sum, 1.0), 0.0)


# ----------------------------------------------------------------------------
# Module wrapper (deterministic init: weight std=0.02, zero bias)
# ----------------------------------------------------------------------------
class BertForBIOAspectClassificationPallas:
    def __init__(self, hidden_size, key, initializer_range=0.02, use_crf=False):
        # TODO(synk): BertModel encoder and ConditionalRandomField (use_crf=True)
        # are not implemented; forward() consumes a precomputed sequence_output.
        assert not use_crf, "use_crf=True not supported"
        self.hidden_size = hidden_size
        w = (jax.random.normal(key, (hidden_size, NUM_CLASSES), jnp.float32)
             * initializer_range)                 # stored transposed vs torch
        b = jnp.zeros((NUM_CLASSES,), jnp.float32)
        self.w, self.b = w, b
        wb = w.astype(jnp.bfloat16)
        # logits path: lane-padded (H, 128) weight + (1, 8) bias
        self.w_hn = (jnp.zeros((hidden_size, LANE), jnp.bfloat16)
                     .at[:, :NUM_CLASSES].set(wb))
        self.b_row = jnp.zeros((1, CLS_PAD), jnp.float32).at[0, :NUM_CLASSES].set(b)
        # loss path: classes-major (128, H) weight + (8, 1) bias
        self.w_cm = (jnp.zeros((LANE, hidden_size), jnp.bfloat16)
                     .at[:NUM_CLASSES, :].set(wb.T))
        self.b_cm = jnp.zeros((CLS_PAD, 1), jnp.float32).at[:NUM_CLASSES, 0].set(b)

    def forward(self, sequence_output, attention_mask, polarity_positions=None,
                *, bm=512):
        # NOTE: the affine matmul runs in bf16 with f32 accumulation (a
        # deliberate, documented precision reduction vs the f32 PyTorch head).
        if polarity_positions is not None:
            return affine_masked_ce_loss(sequence_output, attention_mask,
                                         polarity_positions, self.w_cm,
                                         self.b_cm, bm=bm)
        return affine_logits(sequence_output, self.w_hn, self.b_row, bm=bm)


# ----------------------------------------------------------------------------
# Pure-JAX reference of the same math (bf16-quantized operands to match kernel)
# ----------------------------------------------------------------------------
def _ref_forward(sequence_output, attention_mask, w, b, labels=None):
    N, L, H = sequence_output.shape
    x = sequence_output.reshape(N * L, H).astype(jnp.bfloat16).astype(jnp.float32)
    wf = w.astype(jnp.bfloat16).astype(jnp.float32)
    logits = x @ wf + b
    if labels is None:
        return logits.reshape(N, L, NUM_CLASSES)
    logp = jax.nn.log_softmax(logits, axis=-1)
    per = -jnp.take_along_axis(logp, labels.reshape(-1, 1).astype(jnp.int32),
                               axis=-1)[:, 0]
    m = attention_mask.reshape(-1).astype(jnp.float32)
    return jnp.sum(m * per) / jnp.sum(m)


if __name__ == "__main__":
    key = jax.random.PRNGKey(0)
    N, L, H = 2, 100, 64          # batch, seq len, hidden size (small demo)
    kmod, kseq, klbl = jax.random.split(key, 3)

    model = BertForBIOAspectClassificationPallas(H, kmod)

    lens = np.array([80, 57], np.int32)
    attention_mask = jnp.asarray(
        (np.arange(L)[None, :] < lens[:, None]).astype(np.int32))
    sequence_output = jax.random.normal(kseq, (N, L, H), jnp.float32)
    polarity_positions = jax.random.randint(klbl, (N, L), 0, NUM_CLASSES, jnp.int32)

    # NT=200 -> the bm clamp gives 2 grid blocks with a ragged tail on both
    # paths, exercising the parallel grid and the in-kernel / writeback masking.
    logits = model.forward(sequence_output, attention_mask)
    logits = jax.block_until_ready(logits)
    ref_logits = _ref_forward(sequence_output, attention_mask, model.w, model.b)
    assert logits.shape == (N, L, NUM_CLASSES), logits.shape
    assert jnp.allclose(logits, ref_logits, atol=2e-3, rtol=2e-3), \
        "logits mismatch vs reference"

    loss = model.forward(sequence_output, attention_mask, polarity_positions)
    loss = jax.block_until_ready(loss)
    ref_loss = _ref_forward(sequence_output, attention_mask, model.w, model.b,
                            labels=polarity_positions)
    assert jnp.isfinite(loss), loss
    assert jnp.allclose(loss, ref_loss, atol=2e-3, rtol=2e-3), (loss, ref_loss)

    print("KERNEL_OK")
</pallas_src>

<mosaic_0001>
module attributes {stable_mosaic.version = 11 : i64} {
  func.func @_affine_logits_kernel(%arg0: i32, %arg1: memref<104x64xf32, #tpu.memory_space<vmem>>, %arg2: memref<64x128xbf16, #tpu.memory_space<vmem>>, %arg3: memref<1x8xf32, #tpu.memory_space<vmem>>, %arg4: memref<104x8xf32, #tpu.memory_space<vmem>>) attributes {dimension_semantics = [#tpu.dimension_semantics<parallel>], iteration_bounds = array<i64: 2>, scalar_prefetch = 0 : i64, scratch_operands = 0 : i64, tpu.core_type = #tpu.core_type<tc>, window_params = [{transform_indices = @transform_0, window_bounds = array<i64: 104, 64>}, {pipeline_mode = #tpu.pipeline_mode<synchronous>, transform_indices = @transform_1, window_bounds = array<i64: 64, 128>}, {pipeline_mode = #tpu.pipeline_mode<synchronous>, transform_indices = @transform_2, window_bounds = array<i64: 1, 8>}, {transform_indices = @transform_3, window_bounds = array<i64: 104, 8>}]} {
    %c0 = arith.constant 0 : index
    %c0_0 = arith.constant 0 : index
    %0 = vector.load %arg1[%c0, %c0_0] : memref<104x64xf32, #tpu.memory_space<vmem>>, vector<104x64xf32>
    %1 = arith.truncf %0 : vector<104x64xf32> to vector<104x64xbf16>
    %c0_1 = arith.constant 0 : index
    %c0_2 = arith.constant 0 : index
    %2 = vector.load %arg2[%c0_1, %c0_2] : memref<64x128xbf16, #tpu.memory_space<vmem>>, vector<64x128xbf16>
    %cst = arith.constant dense<0.000000e+00> : vector<104x128xf32>
    %3 = tpu.matmul %1, %2, %cst {dimension_numbers = #tpu.dot_dimension_numbers<[1], [0], [0], [1], [0, 0, 1, 1], [], []>} : vector<104x64xbf16>, vector<64x128xbf16>, vector<104x128xf32> -> vector<104x128xf32>
    %4 = vector.extract_strided_slice %3 {offsets = [0, 0], sizes = [104, 8], strides = [1, 1]} : vector<104x128xf32> to vector<104x8xf32>
    %c0_3 = arith.constant 0 : index
    %c0_4 = arith.constant 0 : index
    %5 = vector.load %arg3[%c0_3, %c0_4] : memref<1x8xf32, #tpu.memory_space<vmem>>, vector<1x8xf32>
    %6 = vector.broadcast %5 : vector<1x8xf32> to vector<104x8xf32>
    %7 = arith.addf %4, %6 : vector<104x8xf32>
    %c0_5 = arith.constant 0 : index
    %c0_6 = arith.constant 0 : index
    %8 = vector.load %arg4[%c0_5, %c0_6] : memref<104x8xf32, #tpu.memory_space<vmem>>, vector<104x8xf32>
    tpu.vector_store %arg4[%c0_5, %c0_6], %7 {strides = array<i32>} : memref<104x8xf32, #tpu.memory_space<vmem>>, vector<104x8xf32>,
    return
  }
  func.func @transform_0(%arg0: i32) -> (i32, i32) {
    %c0_i32 = arith.constant 0 : i32
    %c0_i32_0 = arith.constant 0 : i32
    return %arg0, %c0_i32 : i32, i32
  }
  func.func @transform_1(%arg0: i32) -> (i32, i32) {
    %c0_i32 = arith.constant 0 : i32
    %c0_i32_0 = arith.constant 0 : i32
    %c0_i32_1 = arith.constant 0 : i32
    return %c0_i32, %c0_i32_0 : i32, i32
  }
  func.func @transform_2(%arg0: i32) -> (i32, i32) {
    %c0_i32 = arith.constant 0 : i32
    %c0_i32_0 = arith.constant 0 : i32
    %c0_i32_1 = arith.constant 0 : i32
    return %c0_i32, %c0_i32_0 : i32, i32
  }
  func.func @transform_3(%arg0: i32) -> (i32, i32) {
    %c0_i32 = arith.constant 0 : i32
    %c0_i32_0 = arith.constant 0 : i32
    return %arg0, %c0_i32 : i32, i32
  }
}

</mosaic_0001>

<bundles_post_ra>
// kernel: tpu_custom_call.1
= control target key start
LH: loop header
LB: loop body
LE: loop exit
PB: predicated region body
PF: predicated region fallthrough
CT: control target
= control target key end

     0   :  { %s949_s12 = smov 0   ;;  %s951_s13 = smov 0   ;;  %s1148_s0 = inlined_call_operand.vmem [shape: f32[200,64], index: 0, kind: input, shape index: {}]   ;;  %s1149_s1 = inlined_call_operand.vmem [shape: bf16[64,128], index: 1, kind: input, shape index: {}]   ;;  %s1150_s2 = inlined_call_operand.vmem [shape: f32[1,8], index: 2, kind: input, shape index: {}]   ;;  %s1151_s3 = inlined_call_operand.vmem [shape: f32[200,8], index: 3, kind: output, shape index: {}]  }
   0x1   :  { %s953_s14 = smov 0  }
   0x2 LB: > { %s962_s15 = sadd.s32 4294967295, %s893_s14   ;;  %s964_s16 = sadd.s32 1, %s893_s14   ;;  %s893_s14 = sphi %s953_s14, %s1158_s14   ;;  %s889_s13 = sphi %s951_s13, %s1157_s13   ;;  %s885_s12 = sphi %s949_s12, %s1156_s12  }
   0x3   : > { %s85_s17 = ssub.s32 %s893_s14, %s964_s16  ;;  %s88_s18 = sadd.s32 1, %s889_s13 }
   0x4   : > { %p86_p0 = scmp.eq.s32.totalorder %s85_s17, 0  ;;  %p98_p1 = scmp.ne.s32.totalorder %s889_s13, %s885_s12 }
   0x5   : > { %p99_p2 = scmp.eq.s32.totalorder %s962_s15, 1  ;;  %p657_p3 = scmp.ge.s32.totalorder %s893_s14, 1 }
   0x6   : > { %s972_s19 = scalar_select %p86_p0, %s889_s13, %s88_s18  }
   0x7   : > { %p974_p4 = por %p99_p2, %p98_p1  ;;  %p146_p5 = scmp.lt.s32.totalorder %s893_s14, 3 }
   0x9   : > { %p147_p6 = pnand %p657_p3, %p146_p5 }
   0xa   : > { %v831_v0 = vld [vmem:[%s1149_s1] sm:$0xff] (!%p147_p6)   ;;  %v927_v1 = vmov (!%p147_p6), 0.0   ;;  %v832_v2 = vld [vmem:[%s1149_s1 + $0x8] sm:$0xff] (!%p147_p6)   ;;  %s985_s25 = smul.u32 (!%p147_p6), 13, %s962_s15  ;;  %vm928_vm0 = vmmov (!%p147_p6), 0   ;;  %v833_v3 = vld [vmem:[%s1149_s1 + $0x10] sm:$0xff] (!%p147_p6)  }
   0xb   : > { %150 = sbr.rel (%p147_p6) target bundleno = 329 (0x149), region = 32  ;;  %695 = vmatprep.subr.bf16.mxu0 (!%p147_p6), %v927_v1  ;;  %731 = vmatprep.subr.bf16.mxu1 (!%p147_p6), %v927_v1  ;;  %v834_v4 = vld [vmem:[%s1149_s1 + $0x18] sm:$0xff] (!%p147_p6)   ;;  %vm245_vm1 = vcmask (!%p147_p6), 523264   ;;  %s170_s8 = sand.u32 (!%p147_p6), 1, %s885_s12   ;;  %v670_v25 = vld [vmem:[%s1150_s2] ss:$0 sm:$0xff] (!%p147_p6) }
   0xc   : > { %696 = vmatpush3.bf16.msra.mxu0 (!%p147_p6), %v831_v0  ;;  %735 = vmatpush3.bf16.msra.mxu1 (!%p147_p6), %v831_v0  ;;  %p178_p7 = scmp.lt.s32.totalorder (!%p147_p6), %s985_s25, 24  ;;  %s739_s9 = smul.u32 (!%p147_p6), 104, %s170_s8  ;;  %vm375_vm2 = vcmask (!%p147_p6), 64512  }
   0xd   : > { %697 = vmatprep.subr.bf16.mxu0 (!%p147_p6), %v927_v1  ;;  %732 = vmatprep.subr.bf16.mxu1 (!%p147_p6), %v927_v1 }
   0xe   : > { %703 = vmatprep.mubr.msk.bf16.mxu0 (!%p147_p6), %vm928_vm0, %v927_v1  ;;  %719 = vmatprep.mubr.msk.bf16.mxu1 (!%p147_p6), %vm928_vm0, %v927_v1  ;;  %s1031_s14 = scalar_lea.vmem (!%p147_p6), [#allocation2], %s739_s9  }
  0x10   : > { %698 = vmatpush3.bf16.msra.mxu0 (!%p147_p6), %v832_v2  ;;  %736 = vmatpush3.bf16.msra.mxu1 (!%p147_p6), %v832_v2 }
  0x11   : > { %699 = vmatprep.subr.bf16.mxu0 (!%p147_p6), %v927_v1  ;;  %733 = vmatprep.subr.bf16.mxu1 (!%p147_p6), %v927_v1 }
  0x12   : > { %s179_s28 = scalar_select %p178_p7, %s985_s25, 24 }
  0x13   : > { %s397_s12 = ssub.s32 (%p974_p4), 25, %s985_s25  ;;  %s683_s17 = smul.u32 (%p974_p4), 104, %s962_s15 }
  0x14   : > { %s658_s29 = sshll.u32 %s179_s28, 3  ;;  %700 = vmatpush3.bf16.msra.mxu0 %v833_v3  ;;  %737 = vmatpush3.bf16.msra.mxu1 %v833_v3  ;;  %p398_p8 = scmp.lt.s32.totalorder (%p974_p4), %s397_s12, 13 }
  0x15   : > { %s1000_s7 = scalar_lea.vmem %s1148_s0, %s658_s29  ;;  %701 = vmatprep.subr.bf16.mxu0 %v927_v1  ;;  %734 = vmatprep.subr.bf16.mxu1 %v927_v1  ;;  %s1066_s22 = scalar_lea.vmem (%p974_p4), %s1151_s3, %s683_s17  }
  0x16   : > { %v193_v5 = vld [vmem:[%s1000_s7] sm:$0xff]  ;;  %v194_v6 = vld [vmem:[%s1000_s7 + $0x8] sm:$0xff]  ;;  %v195_v11 = vld [vmem:[%s1000_s7 + $0x10] sm:$0xff] }
  0x17   : > { %v201_v7 = vld [vmem:[%s1000_s7 + $0x40] sm:$0xff]  ;;  %v202_v8 = vld [vmem:[%s1000_s7 + $0x48] sm:$0xff]  ;;  %v206_v9 = vpack.c.bf16 %v194_v6, %v193_v5  ;;  %v196_v12 = vld [vmem:[%s1000_s7 + $0x18] sm:$0xff] }
  0x18   : > { %v210_v10 = vpack.c.bf16 %v202_v8, %v201_v7  ;;  %702 = vmatpush3.bf16.msra.mxu0 %v834_v4  ;;  %738 = vmatpush3.bf16.msra.mxu1 %v834_v4  ;;  %v203_v13 = vld [vmem:[%s1000_s7 + $0x50] sm:$0xff]  ;;  %v204_v14 = vld [vmem:[%s1000_s7 + $0x58] sm:$0xff]  ;;  %v207_v15 = vpack.c.bf16 %v196_v12, %v195_v11  ;;  %v197_v17 = vld [vmem:[%s1000_s7 + $0x20] sm:$0xff] }
  0x19   : > { %v211_v16 = vpack.c.bf16 %v204_v14, %v203_v13  ;;  %v198_v18 = vld [vmem:[%s1000_s7 + $0x28] sm:$0xff]  ;;  %v205_v19 = vld [vmem:[%s1000_s7 + $0x60] sm:$0xff]  ;;  %v199_v22 = vld [vmem:[%s1000_s7 + $0x30] sm:$0xff] }
  0x1a   : > { %v208_v20 = vpack.c.bf16 %v198_v18, %v197_v17  ;;  %v212_v21 = vpack.c.bf16 %v205_v19, %v205_v19  ;;  %v200_v23 = vld [vmem:[%s1000_s7 + $0x38] sm:$0xff] }
  0x1b   : > { %704 = vmatmul.mubr.msk.bf16.vlgmr.msra.gmra.mrb[0].mxu0 %vm245_vm1, %v206_v9  ;;  %720 = vmatmul.mubr.msk.bf16.vlgmr.msra.gmra.mrb[0].mxu1 %vm245_vm1, %v210_v10  ;;  %v209_v24 = vpack.c.bf16 %v200_v23, %v199_v22 }
  0x1c   : > { %707 = vmatprep.mubr.msk.bf16.mxu0 %vm928_vm0, %v927_v1  ;;  %723 = vmatprep.mubr.msk.bf16.mxu1 %vm928_vm0, %v927_v1 }
  0x23   : > { %708 = vmatmul.mubr.msk.bf16.gmra.mrb[4].mxu0 %vm245_vm1, %v207_v15  ;;  %724 = vmatmul.mubr.msk.bf16.gmra.mrb[4].mxu1 %vm245_vm1, %v211_v16 }
  0x24   : > { %711 = vmatprep.mubr.msk.bf16.mxu0 %vm928_vm0, %v927_v1  ;;  %727 = vmatprep.mubr.msk.bf16.mxu1 %vm928_vm0, %v927_v1 }
  0x2b   : > { %712 = vmatmul.mubr.msk.bf16.gmra.mrb[8].mxu0 %vm245_vm1, %v208_v20  ;;  %728 = vmatmul.mubr.msk.bf16.gmra.mrb[8].mxu1 %vm245_vm1, %v212_v21 }
  0x2c   : > { %715 = vmatprep.mubr.msk.bf16.mxu0 %vm928_vm0, %v927_v1 }
  0x33   : > { %716 = vmatmul.mubr.msk.bf16.gmra.mrb[12].mxu0 %vm245_vm1, %v209_v24 }
  0xee   : > { %v301_v26 = vpop.f32.mrb[0].mxu0  ;;  %v333_v27 = vpop.f32.mrb[0].mxu1 }
  0xef   : > { %v362_v28 = vadd.f32 %v670_v25, %v301_v26  ;;  %v705_v29 = vpop.f32.mrb[1].mxu0  ;;  %v370_v30 = vadd.f32 %v670_v25, %v333_v27  ;;  %v721_v31 = vpop.f32.mrb[1].mxu1 }
  0xf0   : > { %v304_v32 = vpop.f32.mrb[2].mxu0  ;;  %v336_v33 = vpop.f32.mrb[2].mxu1 }
  0xf1   : > { %376 = vst.msk [vmem:[%s1031_s14] sm:$0xff] %vm375_vm2, %v362_v28  ;;  %v363_v34 = vadd.f32 %v670_v25, %v304_v32  ;;  %v706_v35 = vpop.f32.mrb[3].mxu0  ;;  %384 = vst.msk [vmem:[%s1031_s14 + $0x40] sm:$0xff] %vm375_vm2, %v370_v30  ;;  %v371_v36 = vadd.f32 %v670_v25, %v336_v33  ;;  %v722_v37 = vpop.f32.mrb[3].mxu1 }
  0xf3   : > { %377 = vst.msk [vmem:[%s1031_s14 + $0x8] sm:$0xff] %vm375_vm2, %v363_v34  ;;  %385 = vst.msk [vmem:[%s1031_s14 + $0x48] sm:$0xff] %vm375_vm2, %v371_v36 }
  0xf6   : > { %v309_v38 = vpop.f32.mrb[4].mxu0  ;;  %v341_v39 = vpop.f32.mrb[4].mxu1 }
  0xf7   : > { %v364_v40 = vadd.f32 %v670_v25, %v309_v38  ;;  %v709_v41 = vpop.f32.mrb[5].mxu0  ;;  %v372_v42 = vadd.f32 %v670_v25, %v341_v39  ;;  %v725_v43 = vpop.f32.mrb[5].mxu1 }
  0xf8   : > { %v312_v44 = vpop.f32.mrb[6].mxu0  ;;  %v344_v45 = vpop.f32.mrb[6].mxu1 }
  0xf9   : > { %378 = vst.msk [vmem:[%s1031_s14 + $0x10] sm:$0xff] %vm375_vm2, %v364_v40  ;;  %v365_v46 = vadd.f32 %v670_v25, %v312_v44  ;;  %v710_v47 = vpop.f32.mrb[7].mxu0  ;;  %386 = vst.msk [vmem:[%s1031_s14 + $0x50] sm:$0xff] %vm375_vm2, %v372_v42  ;;  %v373_v48 = vadd.f32 %v670_v25, %v344_v45  ;;  %v726_v49 = vpop.f32.mrb[7].mxu1 }
  0xfb   : > { %379 = vst.msk [vmem:[%s1031_s14 + $0x18] sm:$0xff] %vm375_vm2, %v365_v46  ;;  %387 = vst.msk [vmem:[%s1031_s14 + $0x58] sm:$0xff] %vm375_vm2, %v373_v48 }
  0xfe   : > { %v317_v50 = vpop.f32.mrb[8].mxu0  ;;  %v349_v51 = vpop.f32.mrb[8].mxu1 }
  0xff   : > { %v366_v52 = vadd.f32 %v670_v25, %v317_v50  ;;  %v713_v53 = vpop.f32.mrb[9].mxu0  ;;  %v374_v54 = vadd.f32 %v670_v25, %v349_v51  ;;  %v729_v55 = vpop.f32.mrb[9].mxu1 }
 0x100   : > { %v320_v56 = vpop.f32.mrb[10].mxu0  ;;  %v352_v57 = vpop.f32.mrb[10].mxu1 }
 0x101   : > { %380 = vst.msk [vmem:[%s1031_s14 + $0x20] sm:$0xff] %vm375_vm2, %v366_v52  ;;  %v367_v58 = vadd.f32 %v670_v25, %v320_v56  ;;  %v714_v59 = vpop.f32.mrb[11].mxu0  ;;  %388 = vst.msk [vmem:[%s1031_s14 + $0x60] sm:$0xff] %vm375_vm2, %v374_v54  ;;  %v730_v60 = vpop.f32.mrb[11].mxu1 }
 0x103   : > { %381 = vst.msk [vmem:[%s1031_s14 + $0x28] sm:$0xff] %vm375_vm2, %v367_v58 }
 0x105   : > { %395 = sbr.rel (!%p974_p4) target bundleno = 329 (0x149), region = 36 }
 0x106   : > { %v325_v61 = vpop.f32.mrb[12].mxu0 }
 0x107   : > { %v368_v62 = vadd.f32 %v670_v25, %v325_v61  ;;  %v717_v63 = vpop.f32.mrb[13].mxu0 }
 0x108   : > { %v328_v0 = vpop.f32.mrb[14].mxu0 }
 0x109   : > { %382 = vst.msk [vmem:[%s1031_s14 + $0x30] sm:$0xff] %vm375_vm2, %v368_v62  ;;  %v369_v1 = vadd.f32 %v670_v25, %v328_v0  ;;  %v718_v2 = vpop.f32.mrb[15].mxu0 }
 0x10b   : > { %383 = vst.msk [vmem:[%s1031_s14 + $0x38] sm:$0xff] %vm375_vm2, %v369_v1 }
 0x10c   : > { %s1160_s12 = smov (!%p398_p8, %s397_s12), 13 }
 0x10d   : > { %s671_s23 = sshll.u32 %s1160_s12, 7 }
 0x10e   : > { %p674_p9 = scmp.eq.s32.totalorder %s671_s23, 0 }
 0x10f   : > { %835 = sdivrem.u32 (!%p674_p9), %s1160_s12, 13 }
 0x110   : > { %406 = sbr.rel (%p674_p9) target bundleno = 329 (0x149), region = 40 }
 0x118   : > { %s1072_s20 = spop.drf %835 }
 0x119   : > { %p675_p10 = scmp.le.s32.totalorder %s1072_s20, 0 }
 0x11a   : > { %s1153_s15 = smov (!%p675_p10), %s1066_s22  ;;  %s1154_s24 = smov (!%p675_p10), %s1031_s14 }
 0x11b   : > { %610 = sbr.rel (%p675_p10) target bundleno = 300 (0x12c), region = 116  ;;  %s1081_s25 = smov (!%p675_p10), 0  }
 0x11c   : > { %s1083_s26 = smov (!%p675_p10), 0  }
 0x122 LB: >> { %v494_v3 = vld [vmem:[%s901_s24] sm:$0xff]  ;;  %v496_v4 = vld [vmem:[%s901_s24 + $0x8] sm:$0xff]  ;;  %v498_v5 = vld [vmem:[%s901_s24 + $0x10] sm:$0xff]  ;;  %s520_s27 = sadd.s32 1, %s905_s25  ;;  %s488_s26 = sadd.s32 1, %s909_s26   ;;  %s909_s26 = sphi %s1083_s26, %s488_s26   ;;  %s905_s25 = sphi %s1081_s25, %s1155_s25   ;;  %s901_s24 = sphi %s1154_s24, %s525_s24   ;;  %s897_s15 = sphi %s1153_s15, %s526_s15  }
 0x123   : >> { %495 = vst [vmem:[%s897_s15] sm:$0xff] %v494_v3  ;;  %497 = vst [vmem:[%s897_s15 + $0x8] sm:$0xff] %v496_v4  ;;  %v500_v6 = vld [vmem:[%s901_s24 + $0x18] sm:$0xff]  ;;  %v502_v7 = vld [vmem:[%s901_s24 + $0x20] sm:$0xff]  ;;  %p521_p11 = scmp.ge.s32.totalorder %s520_s27, %s1072_s20  ;;  %p487_p12 = scmp.ge.s32.totalorder %s488_s26, %s1072_s20 }
 0x124   : >> { %499 = vst [vmem:[%s897_s15 + $0x10] sm:$0xff] %v498_v5  ;;  %v504_v8 = vld [vmem:[%s901_s24 + $0x28] sm:$0xff]  ;;  %501 = vst [vmem:[%s897_s15 + $0x18] sm:$0xff] %v500_v6  ;;  %v506_v9 = vld [vmem:[%s901_s24 + $0x30] sm:$0xff] }
 0x125   : >> { %503 = vst [vmem:[%s897_s15 + $0x20] sm:$0xff] %v502_v7  ;;  %505 = vst [vmem:[%s897_s15 + $0x28] sm:$0xff] %v504_v8  ;;  %v508_v10 = vld [vmem:[%s901_s24 + $0x38] sm:$0xff]  ;;  %v510_v11 = vld [vmem:[%s901_s24 + $0x40] sm:$0xff]  ;;  %s1162_s27 = smov (%p521_p11, %s520_s27), 0  ;;  %490 = sbr.rel (!%p487_p12) target bundleno = 290 (0x122), region = 122 }
 0x126   : >> { %507 = vst [vmem:[%s897_s15 + $0x30] sm:$0xff] %v506_v9  ;;  %509 = vst [vmem:[%s897_s15 + $0x38] sm:$0xff] %v508_v10  ;;  %v512_v12 = vld [vmem:[%s901_s24 + $0x48] sm:$0xff]  ;;  %v514_v13 = vld [vmem:[%s901_s24 + $0x50] sm:$0xff]  ;;  %s523_s28 = smul.u32 104, %s1162_s27  ;;  %s1155_s25 = smov %s1162_s27 }
 0x127   : >> { %511 = vst [vmem:[%s897_s15 + $0x40] sm:$0xff] %v510_v11  ;;  %v516_v14 = vld [vmem:[%s901_s24 + $0x58] sm:$0xff]  ;;  %513 = vst [vmem:[%s897_s15 + $0x48] sm:$0xff] %v512_v12  ;;  %v518_v15 = vld [vmem:[%s901_s24 + $0x60] sm:$0xff] }
 0x128   : >> { %515 = vst [vmem:[%s897_s15 + $0x50] sm:$0xff] %v514_v13  ;;  %517 = vst [vmem:[%s897_s15 + $0x58] sm:$0xff] %v516_v14  ;;  %s525_s24 = scalar_lea.vmem %s1031_s14, %s523_s28 [#allocation2]  }
 0x129   : >> { %519 = vst [vmem:[%s897_s15 + $0x60] sm:$0xff] %v518_v15  ;;  %s526_s15 = scalar_lea.vmem %s1066_s22, %s523_s28  }
 0x12c PF: > { %837 = sdivrem.u32 %s1160_s12, 13 }
 0x12d   : > { %s676_s29 = smul.u32 104, %s1072_s20 }
 0x12f   : > { %s531_s30 = scalar_lea.vmem %s1031_s14, %s676_s29 [#allocation2]   ;;  %s533_s4 = scalar_lea.vmem %s1066_s22, %s676_s29  }
 0x135   : > { %s838_s5 = spop.drf %837 }
 0x136   : > { %p678_p13 = scmp.le.s32.totalorder %s838_s5, 0 }
 0x137   : > { %s911_s6 = smov (!%p678_p13), %s533_s4   ;;  %s915_s7 = smov (!%p678_p13), %s531_s30  }
 0x138   : > { %624 = sbr.rel (%p678_p13) target bundleno = 329 (0x149), region = 127  ;;  %s919_s8 = smov (!%p678_p13), 0  }
 0x139   : > { %s923_s9 = smov (!%p678_p13), 0  }
 0x13f LB: >> { %v543_v16 = vld [vmem:[%s917_s7] sm:$0xff]  ;;  %s545_s10 = sadd.s32 1, %s921_s8  ;;  %s537_s9 = sadd.s32 1, %s925_s9   ;;  %s925_s9 = sphi %s923_s9, %s537_s9   ;;  %s921_s8 = sphi %s919_s8, %s920_s8   ;;  %s917_s7 = sphi %s915_s7, %s550_s7   ;;  %s913_s6 = sphi %s911_s6, %s551_s6  }
 0x140   : >> { %544 = vst [vmem:[%s913_s6] sm:$0xff] %v543_v16  ;;  %p546_p0 = scmp.ge.s32.totalorder %s545_s10, %s838_s5  ;;  %p536_p1 = scmp.ge.s32.totalorder %s537_s9, %s838_s5 }
 0x142   : >> { %s1164_s10 = smov (%p546_p0, %s545_s10), 0  ;;  %539 = sbr.rel (!%p536_p1) target bundleno = 319 (0x13f), region = 133 }
 0x143   : >> { %s679_s11 = sshll.u32 %s1164_s10, 3  ;;  %s920_s8 = smov %s1164_s10  }
 0x144   : >> { %s550_s7 = scalar_lea.vmem %s531_s30, %s679_s11 [#allocation2]   ;;  %s551_s6 = scalar_lea.vmem %s533_s4, %s679_s11  }
 0x149 PF: > { %p10_p2 = scmp.ge.s32.totalorder %s964_s16, 4   ;;  %s1156_s12 = smov %s889_s13 }
 0x14a   : > { %s1157_s13 = smov %s972_s19  ;;  %s1158_s14 = smov %s964_s16 }
 0x14b   :  { %12 = sbr.rel (!%p10_p2) target bundleno = 2 (0x2), region = 144 }

</bundles_post_ra>
